<compile_context>
chip_gen: v7x
topology: tpu7x:2x2x1
jax: 0.10.0
libtpu: 0.0.40
codegen_flags: <defaults>
</compile_context>

<pallas_src>
import jax
import jax.numpy as jnp
from jax import lax
from jax.experimental import pallas as pl
from jax.experimental.pallas import tpu as pltpu

TEMPERATURE = 0.1  # KPDetector softmax temperature


def _kp_detector_kernel(x_ref, w1_ref, b1_ref, w2_ref, b2_ref, grid_ref, out_ref):
    # Lane axis last everywhere:
    #   x_ref:    (C, B*HW)  all images concatenated along lanes
    #   w1_ref:   (F, C)     feature 1x1 conv weights
    #   b1_ref:   (F, 1)
    #   w2_ref:   (K, F)     heatmap 1x1 conv weights (K = num keypoints)
    #   b2_ref:   (K, 1)
    #   grid_ref: (3, HW)    rows = [grid_x, grid_y, ones]
    #   out_ref:  (B, 2, K)  rows = [kp_x, kp_y]
    C = x_ref.shape[0]
    B = out_ref.shape[0]
    HW = grid_ref.shape[1]
    inv_temp = 1.0 / TEMPERATURE

    # Grid-invariant loads hoisted out of the per-image loop (JAX does not CSE
    # broadcast_in_dim, so weight/bias broadcasts must happen exactly once).
    x = x_ref[...]                                   # (C, B*HW)
    g = grid_ref[...]                                # (3, HW)

    # Feature 1x1 conv + ReLU for the whole batch as one slab.
    # C is tiny (4) -> VPU FMA chain instead of a heavily padded MXU pass.
    h = b1_ref[...] + w1_ref[:, 0:1] * x[0:1, :]     # (F, B*HW)
    for c in range(1, C):
        h = h + w1_ref[:, c:c + 1] * x[c:c + 1, :]
    h = jnp.maximum(h, 0.0)

    # Heatmap 1x1 conv: ONE MXU pass across the batch (N = B*HW >= 512)
    # instead of per-image pushes/drains.
    logits = (jnp.dot(w2_ref[...], h, preferred_element_type=jnp.float32)
              + b2_ref[...]) * inv_temp              # (K, B*HW)

    # Per-image softmax + expected-coordinate extraction.  Static slices at
    # 256-lane (multiple-of-128) boundaries are free; B is tiny -> unroll.
    for bi in range(B):
        lg = logits[:, bi * HW:(bi + 1) * HW]        # (K, HW)
        m = jnp.max(lg, axis=-1, keepdims=True)      # (K, 1)
        e = jnp.exp(lg - m)                          # (K, HW), unnormalized

        # Expectation + softmax denominator in one MXU contraction over HW
        # (rows of g are [x, y, ones]); replaces the old (3, K, HW) VPU
        # broadcast-multiply + cross-lane XLU reduce.
        sums = lax.dot_general(
            g, e,
            dimension_numbers=(((1,), (1,)), ((), ())),
            preferred_element_type=jnp.float32)      # (3, K)

        # Normalize after the contraction: a (2, K) divide.
        out_ref[bi] = sums[0:2, :] / sums[2:3, :]


def kp_detector_pallas(x_nchw, w1, b1, w2, b2):
    """x_nchw: (B, C, H, W) float32 -> keypoints (B, K, 2) in [-1, 1]."""
    B, C, H, W = x_nchw.shape
    HW = H * W
    F = w1.shape[1]
    K = w2.shape[1]

    # --- trace-time glue (layout plumbing only, outside the kernel) ---
    # (B, C, HW) -> (C, B*HW): images concatenated along the lane axis so the
    # kernel does all MXU work in a single batched pass.
    x_slab = jnp.transpose(x_nchw.reshape(B, C, HW), (1, 0, 2)).reshape(C, B * HW)
    w1_t = jnp.transpose(w1)               # (F, C)
    w2_t = jnp.transpose(w2)               # (K, F)
    b1_c = b1.reshape(F, 1)
    b2_c = b2.reshape(K, 1)

    # Normalized coordinate grid matching torch make_coordinate_grid order
    # (x, y), plus a row of ones so the softmax denominator falls out of the
    # same in-kernel contraction.
    ys = 2.0 * (jnp.arange(H, dtype=jnp.float32) / max(H - 1, 1)) - 1.0
    xs = 2.0 * (jnp.arange(W, dtype=jnp.float32) / max(W - 1, 1)) - 1.0
    gy, gx = jnp.meshgrid(ys, xs, indexing="ij")
    grid_ext = jnp.stack(
        [gx.reshape(HW), gy.reshape(HW), jnp.ones((HW,), jnp.float32)], axis=0)  # (3, HW)

    out = pl.pallas_call(
        _kp_detector_kernel,
        out_shape=jax.ShapeDtypeStruct((B, 2, K), jnp.float32),
        grid_spec=pltpu.PrefetchScalarGridSpec(
            num_scalar_prefetch=0,
            grid=(1,),  # single step: whole batch in one block (no per-step overhead)
            in_specs=[
                pl.BlockSpec((C, B * HW), lambda i: (0, 0)),
                pl.BlockSpec((F, C), lambda i: (0, 0)),
                pl.BlockSpec((F, 1), lambda i: (0, 0)),
                pl.BlockSpec((K, F), lambda i: (0, 0)),
                pl.BlockSpec((K, 1), lambda i: (0, 0)),
                pl.BlockSpec((3, HW), lambda i: (0, 0)),
            ],
            out_specs=pl.BlockSpec((B, 2, K), lambda i: (0, 0, 0)),
        ),
        compiler_params=pltpu.CompilerParams(
            dimension_semantics=("arbitrary",),
        ),
    )(x_slab, w1_t, b1_c, w2_t, b2_c, grid_ext)

    # glue: lane-friendly (B, 2, K) kernel output -> (B, K, 2)
    return jnp.transpose(out, (0, 2, 1))


def kp_detector_ref(x_nchw, w1, b1, w2, b2):
    """Pure-JAX reference for correctness checking."""
    B, C, H, W = x_nchw.shape
    HW = H * W
    x = jnp.transpose(x_nchw, (0, 2, 3, 1)).reshape(B, HW, C)
    h = jnp.maximum(jnp.einsum("bsc,cf->bsf", x, w1, precision="highest") + b1, 0.0)
    logits = (jnp.einsum("bsf,fk->bsk", h, w2, precision="highest") + b2) / TEMPERATURE
    p = jax.nn.softmax(logits, axis=1)  # softmax over HW
    ys = 2.0 * (jnp.arange(H, dtype=jnp.float32) / (H - 1)) - 1.0
    xs = 2.0 * (jnp.arange(W, dtype=jnp.float32) / (W - 1)) - 1.0
    gy, gx = jnp.meshgrid(ys, xs, indexing="ij")
    grid = jnp.stack([gx, gy], axis=-1).reshape(HW, 2)
    return jnp.einsum("bsk,sd->bkd", p, grid, precision="highest")


if __name__ == "__main__":
    key = jax.random.PRNGKey(0)
    kx, k1, k2, k3, k4 = jax.random.split(key, 5)

    # small shapes consistent with the KPDetector forward
    B, C, H, W = 2, 4, 16, 16   # input image, NCHW (PyTorch convention)
    F, K = 32, 10               # hidden features, num keypoints

    x = jax.random.normal(kx, (B, C, H, W), dtype=jnp.float32)

    # deterministic synthetic parameters (no checkpoint loading)
    w1 = jax.random.normal(k1, (C, F), dtype=jnp.float32) * 0.1
    b1 = jax.random.normal(k2, (F,), dtype=jnp.float32) * 0.01
    w2 = jax.random.normal(k3, (F, K), dtype=jnp.float32) * 0.1
    b2 = jax.random.normal(k4, (K,), dtype=jnp.float32) * 0.01

    kp = kp_detector_pallas(x, w1, b1, w2, b2)
    kp = jax.block_until_ready(kp)

    ref = kp_detector_ref(x, w1, b1, w2, b2)
    assert kp.shape == (B, K, 2)
    assert jnp.allclose(kp, ref, atol=1e-4, rtol=1e-4)

    print("KERNEL_OK")
</pallas_src>

<mosaic_0001>
module attributes {stable_mosaic.version = 11 : i64} {
  func.func @_kp_detector_kernel(%arg0: i32, %arg1: memref<4x512xf32, #tpu.memory_space<vmem>>, %arg2: memref<32x4xf32, #tpu.memory_space<vmem>>, %arg3: memref<32x1xf32, #tpu.memory_space<vmem>>, %arg4: memref<10x32xf32, #tpu.memory_space<vmem>>, %arg5: memref<10x1xf32, #tpu.memory_space<vmem>>, %arg6: memref<3x256xf32, #tpu.memory_space<vmem>>, %arg7: memref<2x2x10xf32, #tpu.memory_space<vmem>>) attributes {dimension_semantics = [#tpu.dimension_semantics<arbitrary>], iteration_bounds = array<i64: 1>, scalar_prefetch = 0 : i64, scratch_operands = 0 : i64, tpu.core_type = #tpu.core_type<tc>, window_params = [{pipeline_mode = #tpu.pipeline_mode<synchronous>, transform_indices = @transform_0, window_bounds = array<i64: 4, 512>}, {pipeline_mode = #tpu.pipeline_mode<synchronous>, transform_indices = @transform_1, window_bounds = array<i64: 32, 4>}, {pipeline_mode = #tpu.pipeline_mode<synchronous>, transform_indices = @transform_2, window_bounds = array<i64: 32, 1>}, {pipeline_mode = #tpu.pipeline_mode<synchronous>, transform_indices = @transform_3, window_bounds = array<i64: 10, 32>}, {pipeline_mode = #tpu.pipeline_mode<synchronous>, transform_indices = @transform_4, window_bounds = array<i64: 10, 1>}, {pipeline_mode = #tpu.pipeline_mode<synchronous>, transform_indices = @transform_5, window_bounds = array<i64: 3, 256>}, {pipeline_mode = #tpu.pipeline_mode<synchronous>, transform_indices = @transform_6, window_bounds = array<i64: 2, 2, 10>}]} {
    %c0 = arith.constant 0 : index
    %c0_0 = arith.constant 0 : index
    %0 = vector.load %arg1[%c0, %c0_0] : memref<4x512xf32, #tpu.memory_space<vmem>>, vector<4x512xf32>
    %c0_1 = arith.constant 0 : index
    %c0_2 = arith.constant 0 : index
    %1 = vector.load %arg6[%c0_1, %c0_2] : memref<3x256xf32, #tpu.memory_space<vmem>>, vector<3x256xf32>
    %c0_3 = arith.constant 0 : index
    %c0_4 = arith.constant 0 : index
    %2 = vector.load %arg3[%c0_3, %c0_4] : memref<32x1xf32, #tpu.memory_space<vmem>>, vector<32x1xf32>
    %c0_5 = arith.constant 0 : index
    %c0_6 = arith.constant 0 : index
    %3 = vector.load %arg2[%c0_5, %c0_6] : memref<32x4xf32, #tpu.memory_space<vmem>>, vector<32x1xf32>
    %4 = vector.extract_strided_slice %0 {offsets = [0, 0], sizes = [1, 512], strides = [1, 1]} : vector<4x512xf32> to vector<1x512xf32>
    %5 = vector.broadcast %3 : vector<32x1xf32> to vector<32x512xf32>
    %6 = vector.broadcast %4 : vector<1x512xf32> to vector<32x512xf32>
    %7 = arith.mulf %5, %6 : vector<32x512xf32>
    %8 = vector.broadcast %2 : vector<32x1xf32> to vector<32x512xf32>
    %9 = arith.addf %8, %7 : vector<32x512xf32>
    %c0_7 = arith.constant 0 : index
    %c1 = arith.constant 1 : index
    %10 = vector.load %arg2[%c0_7, %c1] : memref<32x4xf32, #tpu.memory_space<vmem>>, vector<32x1xf32>
    %11 = vector.extract_strided_slice %0 {offsets = [1, 0], sizes = [1, 512], strides = [1, 1]} : vector<4x512xf32> to vector<1x512xf32>
    %12 = vector.broadcast %10 : vector<32x1xf32> to vector<32x512xf32>
    %13 = vector.broadcast %11 : vector<1x512xf32> to vector<32x512xf32>
    %14 = arith.mulf %12, %13 : vector<32x512xf32>
    %15 = arith.addf %9, %14 : vector<32x512xf32>
    %c0_8 = arith.constant 0 : index
    %c2 = arith.constant 2 : index
    %16 = vector.load %arg2[%c0_8, %c2] : memref<32x4xf32, #tpu.memory_space<vmem>>, vector<32x1xf32>
    %17 = vector.extract_strided_slice %0 {offsets = [2, 0], sizes = [1, 512], strides = [1, 1]} : vector<4x512xf32> to vector<1x512xf32>
    %18 = vector.broadcast %16 : vector<32x1xf32> to vector<32x512xf32>
    %19 = vector.broadcast %17 : vector<1x512xf32> to vector<32x512xf32>
    %20 = arith.mulf %18, %19 : vector<32x512xf32>
    %21 = arith.addf %15, %20 : vector<32x512xf32>
    %c0_9 = arith.constant 0 : index
    %c3 = arith.constant 3 : index
    %22 = vector.load %arg2[%c0_9, %c3] : memref<32x4xf32, #tpu.memory_space<vmem>>, vector<32x1xf32>
    %23 = vector.extract_strided_slice %0 {offsets = [3, 0], sizes = [1, 512], strides = [1, 1]} : vector<4x512xf32> to vector<1x512xf32>
    %24 = vector.broadcast %22 : vector<32x1xf32> to vector<32x512xf32>
    %25 = vector.broadcast %23 : vector<1x512xf32> to vector<32x512xf32>
    %26 = arith.mulf %24, %25 : vector<32x512xf32>
    %27 = arith.addf %21, %26 : vector<32x512xf32>
    %cst = arith.constant 0.000000e+00 : f32
    %28 = vector.broadcast %cst : f32 to vector<32x512xf32>
    %29 = arith.maximumf %27, %28 : vector<32x512xf32>
    %c0_10 = arith.constant 0 : index
    %c0_11 = arith.constant 0 : index
    %30 = vector.load %arg4[%c0_10, %c0_11] : memref<10x32xf32, #tpu.memory_space<vmem>>, vector<10x32xf32>
    %cst_12 = arith.constant dense<0.000000e+00> : vector<10x512xf32>
    %31 = tpu.matmul %30, %29, %cst_12 {dimension_numbers = #tpu.dot_dimension_numbers<[1], [0], [0], [1], [0, 0, 1, 1], [], []>} : vector<10x32xf32>, vector<32x512xf32>, vector<10x512xf32> -> vector<10x512xf32>
    %c0_13 = arith.constant 0 : index
    %c0_14 = arith.constant 0 : index
    %32 = vector.load %arg5[%c0_13, %c0_14] : memref<10x1xf32, #tpu.memory_space<vmem>>, vector<10x1xf32>
    %33 = vector.broadcast %32 : vector<10x1xf32> to vector<10x512xf32>
    %34 = arith.addf %31, %33 : vector<10x512xf32>
    %cst_15 = arith.constant 1.000000e+01 : f32
    %35 = vector.broadcast %cst_15 : f32 to vector<10x512xf32>
    %36 = arith.mulf %34, %35 : vector<10x512xf32>
    %37 = vector.extract_strided_slice %36 {offsets = [0, 0], sizes = [10, 256], strides = [1, 1]} : vector<10x512xf32> to vector<10x256xf32>
    %cst_16 = arith.constant dense<0xFF800000> : vector<10xf32>
    %38 = vector.multi_reduction <maximumf>, %37, %cst_16 [1] : vector<10x256xf32> to vector<10xf32>
    %39 = vector.shape_cast %38 : vector<10xf32> to vector<10x1xf32>
    %40 = vector.broadcast %39 : vector<10x1xf32> to vector<10x256xf32>
    %41 = arith.subf %37, %40 : vector<10x256xf32>
    %42 = math.exp %41 : vector<10x256xf32>
    %cst_17 = arith.constant dense<0.000000e+00> : vector<3x10xf32>
    %43 = tpu.matmul %1, %42, %cst_17 {dimension_numbers = #tpu.dot_dimension_numbers<[1], [1], [0], [0], [0, 0, 1, 0], [], []>} : vector<3x256xf32>, vector<10x256xf32>, vector<3x10xf32> -> vector<3x10xf32>
    %44 = vector.extract_strided_slice %43 {offsets = [0, 0], sizes = [2, 10], strides = [1, 1]} : vector<3x10xf32> to vector<2x10xf32>
    %45 = vector.extract_strided_slice %43 {offsets = [2, 0], sizes = [1, 10], strides = [1, 1]} : vector<3x10xf32> to vector<1x10xf32>
    %46 = vector.broadcast %45 : vector<1x10xf32> to vector<2x10xf32>
    %47 = arith.divf %44, %46 : vector<2x10xf32>
    %c0_18 = arith.constant 0 : index
    %c0_19 = arith.constant 0 : index
    %c0_20 = arith.constant 0 : index
    %48 = vector.load %arg7[%c0_18, %c0_19, %c0_20] : memref<2x2x10xf32, #tpu.memory_space<vmem>>, vector<1x2x10xf32>
    %49 = vector.shape_cast %48 : vector<1x2x10xf32> to vector<2x10xf32>
    %50 = vector.shape_cast %47 : vector<2x10xf32> to vector<1x2x10xf32>
    tpu.vector_store %arg7[%c0_18, %c0_19, %c0_20], %50 {strides = array<i32>} : memref<2x2x10xf32, #tpu.memory_space<vmem>>, vector<1x2x10xf32>,
    %51 = vector.extract_strided_slice %36 {offsets = [0, 256], sizes = [10, 256], strides = [1, 1]} : vector<10x512xf32> to vector<10x256xf32>
    %cst_21 = arith.constant dense<0xFF800000> : vector<10xf32>
    %52 = vector.multi_reduction <maximumf>, %51, %cst_21 [1] : vector<10x256xf32> to vector<10xf32>
    %53 = vector.shape_cast %52 : vector<10xf32> to vector<10x1xf32>
    %54 = vector.broadcast %53 : vector<10x1xf32> to vector<10x256xf32>
    %55 = arith.subf %51, %54 : vector<10x256xf32>
    %56 = math.exp %55 : vector<10x256xf32>
    %cst_22 = arith.constant dense<0.000000e+00> : vector<3x10xf32>
    %57 = tpu.matmul %1, %56, %cst_22 {dimension_numbers = #tpu.dot_dimension_numbers<[1], [1], [0], [0], [0, 0, 1, 0], [], []>} : vector<3x256xf32>, vector<10x256xf32>, vector<3x10xf32> -> vector<3x10xf32>
    %58 = vector.extract_strided_slice %57 {offsets = [0, 0], sizes = [2, 10], strides = [1, 1]} : vector<3x10xf32> to vector<2x10xf32>
    %59 = vector.extract_strided_slice %57 {offsets = [2, 0], sizes = [1, 10], strides = [1, 1]} : vector<3x10xf32> to vector<1x10xf32>
    %60 = vector.broadcast %59 : vector<1x10xf32> to vector<2x10xf32>
    %61 = arith.divf %58, %60 : vector<2x10xf32>
    %c1_23 = arith.constant 1 : index
    %c0_24 = arith.constant 0 : index
    %c0_25 = arith.constant 0 : index
    %62 = vector.load %arg7[%c1_23, %c0_24, %c0_25] : memref<2x2x10xf32, #tpu.memory_space<vmem>>, vector<1x2x10xf32>
    %63 = vector.shape_cast %62 : vector<1x2x10xf32> to vector<2x10xf32>
    %64 = vector.shape_cast %61 : vector<2x10xf32> to vector<1x2x10xf32>
    tpu.vector_store %arg7[%c1_23, %c0_24, %c0_25], %64 {strides = array<i32>} : memref<2x2x10xf32, #tpu.memory_space<vmem>>, vector<1x2x10xf32>,
    return
  }
  func.func @transform_0(%arg0: i32) -> (i32, i32) {
    %c0_i32 = arith.constant 0 : i32
    %c0_i32_0 = arith.constant 0 : i32
    %c0_i32_1 = arith.constant 0 : i32
    return %c0_i32, %c0_i32_0 : i32, i32
  }
  func.func @transform_1(%arg0: i32) -> (i32, i32) {
    %c0_i32 = arith.constant 0 : i32
    %c0_i32_0 = arith.constant 0 : i32
    %c0_i32_1 = arith.constant 0 : i32
    return %c0_i32, %c0_i32_0 : i32, i32
  }
  func.func @transform_2(%arg0: i32) -> (i32, i32) {
    %c0_i32 = arith.constant 0 : i32
    %c0_i32_0 = arith.constant 0 : i32
    %c0_i32_1 = arith.constant 0 : i32
    return %c0_i32, %c0_i32_0 : i32, i32
  }
  func.func @transform_3(%arg0: i32) -> (i32, i32) {
    %c0_i32 = arith.constant 0 : i32
    %c0_i32_0 = arith.constant 0 : i32
    %c0_i32_1 = arith.constant 0 : i32
    return %c0_i32, %c0_i32_0 : i32, i32
  }
  func.func @transform_4(%arg0: i32) -> (i32, i32) {
    %c0_i32 = arith.constant 0 : i32
    %c0_i32_0 = arith.constant 0 : i32
    %c0_i32_1 = arith.constant 0 : i32
    return %c0_i32, %c0_i32_0 : i32, i32
  }
  func.func @transform_5(%arg0: i32) -> (i32, i32) {
    %c0_i32 = arith.constant 0 : i32
    %c0_i32_0 = arith.constant 0 : i32
    %c0_i32_1 = arith.constant 0 : i32
    return %c0_i32, %c0_i32_0 : i32, i32
  }
  func.func @transform_6(%arg0: i32) -> (i32, i32, i32) {
    %c0_i32 = arith.constant 0 : i32
    %c0_i32_0 = arith.constant 0 : i32
    %c0_i32_1 = arith.constant 0 : i32
    %c0_i32_2 = arith.constant 0 : i32
    return %c0_i32, %c0_i32_0, %c0_i32_1 : i32, i32, i32
  }
}

</mosaic_0001>

<bundles_post_ra>
// kernel: tpu_custom_call.1
= control target key start
LH: loop header
LB: loop body
LE: loop exit
PB: predicated region body
PF: predicated region fallthrough
CT: control target
= control target key end

     0   :  { %v907_v2 = vmov 0   ;;  %s1111_s0 = inlined_call_operand.vmem [shape: f32[4,512], index: 0, kind: input, shape index: {}]   ;;  %s1112_s1 = inlined_call_operand.vmem [shape: f32[32,4], index: 1, kind: input, shape index: {}]   ;;  %s1113_s2 = inlined_call_operand.vmem [shape: f32[32,1], index: 2, kind: input, shape index: {}]   ;;  %s1114_s3 = inlined_call_operand.vmem [shape: f32[10,32], index: 3, kind: input, shape index: {}]   ;;  %s1115_s4 = inlined_call_operand.vmem [shape: f32[10,1], index: 4, kind: input, shape index: {}]   ;;  %s1116_s5 = inlined_call_operand.vmem [shape: f32[3,256], index: 5, kind: input, shape index: {}]   ;;  %s1117_s6 = inlined_call_operand.hbm [shape: f32[2,2,10], index: 6, kind: output, shape index: {}]  }
   0x1   :  { %v31_v0 = vld [vmem:[%s1112_s1] sm:$0xff]  ;;  %849 = vset.pattern.permute.xlu1 %v907_v2  ;;  %848 = vset.pattern.permute.xlu0 %v907_v2  ;;  %v32_v3 = vld [vmem:[%s1112_s1 + $0x8] sm:$0xff] }
   0x2   :  { %v27_v1 = vld [vmem:[%s1113_s2] sm:$0xff]  ;;  %37 = vperm.xlu0 %848, %v31_v0   ;;  %v28_v4 = vld [vmem:[%s1113_s2 + $0x8] sm:$0xff] }
   0x3   :  { %111 = vperm.xlu1 %849, %v27_v1  }
   0x4   :  { %11 = vsyncpa [#allocation3], 0  ;;  %v34_v5 = vld [vmem:[%s1112_s1 + $0x18] sm:$0xff]  ;;  %v908_v6 = vmov 1   ;;  %v29_v7 = vld [vmem:[%s1113_s2 + $0x10] sm:$0xff]  ;;  %v909_v9 = vmov 2   ;;  %v57_v15 = vlaneseq }
   0x5   :  { %v33_v8 = vld [vmem:[%s1112_s1 + $0x10] sm:$0xff]  ;;  %v910_v10 = vmov 3   ;;  %v30_v11 = vld [vmem:[%s1113_s2 + $0x18] sm:$0xff]  ;;  %v1118_v12 = vmov 0.0   ;;  %v415_v13 = vld [vmem:[%s1115_s4] sm:$0xff]  ;;  %vm427_vm0 = vcmask 261120  }
   0x6   :  { %42 = vperm.xlu0 %848, %v32_v3   ;;  %498 = vmatprep.mubr.f32.mxu0 %v1118_v12  ;;  %v416_v14 = vld [vmem:[%s1115_s4 + $0x8] sm:$0x3]  ;;  %v58_v16 = vshrl.u32 %v57_v15, 7  ;;  %v24_v23 = vld [vmem:[%s1111_s0] sm:$0xff]  ;;  %vm599_vm1 = vcmask 1041408   ;;  %vm696_vm2 = vcmask 74752  }
   0x7   :  { %116 = vperm.xlu1 %849, %v28_v4   ;;  %575 = vmatprep.mubr.f32.mxu1 %v1118_v12  ;;  %v25_v25 = vld [vmem:[%s1111_s0 + $0x8] sm:$0xff] }
   0x8   :  { %v59_v19 = vsub.s32 0, %v58_v16  ;;  %v63_v22 = vsub.s32 4, %v58_v16  ;;  %v163_v24 = vsub.s32 1, %v58_v16  ;;  %v167_v26 = vsub.s32 5, %v58_v16 }
   0x9   :  { %v992_v35 = vsub.s32 2, %v58_v16  ;;  %v251_v36 = vsub.s32 6, %v58_v16  ;;  %v331_v39 = vsub.s32 3, %v58_v16  ;;  %v335_v42 = vsub.s32 7, %v58_v16 }
   0xa   :  { %52 = vperm.xlu0 %848, %v34_v5   ;;  %v60_v27 = vrot.slane %v24_v23, %v59_v19  ;;  %v64_v29 = vrot.slane %v24_v23, %v63_v22  ;;  %v68_v30 = vrot.slane %v25_v25, %v59_v19  ;;  %v72_v31 = vrot.slane %v25_v25, %v63_v22 }
   0xb   :  { %850 = vset.pattern.permute.xlu1 %v908_v6  ;;  %v164_v33 = vrot.slane %v24_v23, %v163_v24  ;;  %v168_v34 = vrot.slane %v24_v23, %v167_v26  ;;  %1122 = vst [vmem:[#allocation5_spill] sm:$0xff] %v992_v35  ;;  %v172_v37 = vrot.slane %v25_v25, %v163_v24 }
   0xc   :  { %150 = vperm.xlu1 %850, %v32_v3   ;;  %v176_v38 = vrot.slane %v25_v25, %v167_v26  ;;  %v80_v40 = vrot.slane %v60_v27, %v59_v19  ;;  %v84_v43 = vrot.slane %v64_v29, %v59_v19  ;;  %v88_v44 = vrot.slane %v68_v30, %v59_v19 }
   0xd   :  { %v92_v45 = vrot.slane %v72_v31, %v59_v19  ;;  %v996_v46 = vrot.slane %v164_v33, %v163_v24  ;;  %v998_v47 = vrot.slane %v168_v34, %v163_v24  ;;  %v248_v49 = vrot.slane %v24_v23, %v992_v35 }
   0xe   :  { %121 = vperm.xlu0 %848, %v29_v7   ;;  %v252_v50 = vrot.slane %v24_v23, %v251_v36  ;;  %v256_v51 = vrot.slane %v25_v25, %v992_v35  ;;  %v1002_v52 = vrot.slane %v172_v37, %v163_v24  ;;  %v1004_v53 = vrot.slane %v176_v38, %v163_v24 }
   0xf   :  { %v260_v54 = vrot.slane %v25_v25, %v251_v36  ;;  %v332_v55 = vrot.slane %v24_v23, %v331_v39  ;;  %v340_v57 = vrot.slane %v25_v25, %v331_v39  ;;  %v336_v58 = vrot.slane %v24_v23, %v335_v42 }
  0x10   :  { %851 = vset.pattern.permute.xlu1 %v907_v2  ;;  %v344_v59 = vrot.slane %v25_v25, %v335_v42  ;;  %v1013_v4 = vrot.slane %v256_v51, %v992_v35 }
  0x11   :  { %47 = vperm.xlu1 %851, %v33_v8  }
  0x12   :  { %853 = vset.pattern.permute.xlu0 %v908_v6 }
  0x13   :  { %146 = vperm.xlu0 %853, %v31_v0  }
  0x15   :  { %852 = vset.pattern.permute.xlu1 %v909_v9 }
  0x16   :  { %230 = vperm.xlu1 %852, %v31_v0  }
  0x17   :  { %154 = vperm.xlu0 %853, %v33_v8  }
  0x1a   :  { %234 = vperm.xlu1 %852, %v32_v3  }
  0x1b   :  { %857 = vset.pattern.permute.xlu0 %v910_v10 }
  0x1c   :  { %318 = vperm.xlu0 %857, %v32_v3   ;;  %v1010_v3 = vrot.slane %v252_v50, %v992_v35 }
  0x1e   :  { %854 = vset.pattern.permute.xlu1 %v907_v2 }
  0x1f   :  { %126 = vperm.xlu1 %854, %v30_v11   ;;  %v1020_v11 = vrot.slane %v340_v57, %v331_v39 }
  0x20   :  { %322 = vperm.xlu0 %857, %v33_v8  }
  0x23   :  { %855 = vset.pattern.permute.xlu1 %v908_v6 }
  0x24   :  { %158 = vperm.xlu1 %855, %v34_v5   ;;  %860 = vset.pattern.permute.xlu0 %v907_v2 }
  0x25   :  { %424 = vperm.xlu0 %860, %v416_v14   ;;  %v1024_v14 = vrot.slane %v344_v59, %v331_v39 }
  0x28   :  { %856 = vset.pattern.permute.xlu1 %v910_v10 }
  0x29   :  { %314 = vperm.xlu1 %856, %v31_v0  }
  0x2d   :  { %858 = vset.pattern.permute.xlu1 %v909_v9  ;;  %v1018_v9 = vrot.slane %v332_v55, %v331_v39 }
  0x2e   :  { %238 = vperm.xlu1 %858, %v33_v8   ;;  %v1016_v8 = vrot.slane %v260_v54, %v992_v35 }
  0x32   :  { %242 = vperm.xlu1 %858, %v34_v5  }
  0x36   :  { %859 = vset.pattern.permute.xlu1 %v910_v10 }
  0x37   :  { %326 = vperm.xlu1 %859, %v34_v5  }
  0x3b   :  { %861 = vset.pattern.permute.xlu1 %v907_v2  ;;  %v1007_v2 = vrot.slane %v248_v49, %v992_v35 }
  0x3c   :  { %419 = vperm.xlu1 %861, %v415_v13   ;;  %v1022_v13 = vrot.slane %v336_v58, %v331_v39 }
  0x81   :  { %v38_v17 = vpop.permute.xlu0 %37 }
  0x82   :  { %v112_v18 = vpop.permute.xlu1 %111  ;;  %v93_v56 = vmul.f32 %v80_v40, %v38_v17  ;;  %v94_v60 = vmul.f32 %v84_v43, %v38_v17  ;;  %v95_v61 = vmul.f32 %v88_v44, %v38_v17  ;;  %v96_v62 = vmul.f32 %v92_v45, %v38_v17 }
  0x84   :  { %v129_v10 = vadd.f32 %v112_v18, %v93_v56  ;;  %v130_v15 = vadd.f32 %v112_v18, %v94_v60  ;;  %v131_v16 = vadd.f32 %v112_v18, %v95_v61  ;;  %v132_v17 = vadd.f32 %v112_v18, %v96_v62 }
  0x85   :  { %v43_v20 = vpop.permute.xlu0 %42 }
  0x86   :  { %v982_v21 = vpop.permute.xlu1 %116  ;;  %v97_v63 = vmul.f32 %v80_v40, %v43_v20  ;;  %v98_v1 = vmul.f32 %v84_v43, %v43_v20  ;;  %v99_v5 = vmul.f32 %v88_v44, %v43_v20  ;;  %v100_v6 = vmul.f32 %v92_v45, %v43_v20 }
  0x88   :  { %v133_v19 = vadd.f32 %v982_v21, %v97_v63  ;;  %v134_v20 = vadd.f32 %v982_v21, %v98_v1  ;;  %v135_v25 = vadd.f32 %v982_v21, %v99_v5  ;;  %v136_v26 = vadd.f32 %v982_v21, %v100_v6 }
  0x89   :  { %v990_v28 = vpop.permute.xlu0 %52 }
  0x8a   :  { %v105_v18 = vmul.f32 %v80_v40, %v990_v28  ;;  %v106_v37 = vmul.f32 %v84_v43, %v990_v28  ;;  %v107_v38 = vmul.f32 %v88_v44, %v990_v28  ;;  %v108_v21 = vmul.f32 %v92_v45, %v990_v28 }
  0x8b   :  { %v151_v32 = vpop.permute.xlu1 %150 }
  0x8c   :  { %v201_v22 = vmul.f32 %v996_v46, %v151_v32  ;;  %v202_v23 = vmul.f32 %v998_v47, %v151_v32  ;;  %v203_v24 = vmul.f32 %v1002_v52, %v151_v32  ;;  %v204_v27 = vmul.f32 %v1004_v53, %v151_v32 }
  0x8d   :  { %v994_v41 = vpop.permute.xlu0 %121 }
  0x8e   :  { %v217_v32 = vadd.f32 %v201_v22, %v133_v19  ;;  %v219_v49 = vadd.f32 %v203_v24, %v135_v25  ;;  %v218_v50 = vadd.f32 %v202_v23, %v134_v20  ;;  %v220_v55 = vadd.f32 %v204_v27, %v136_v26 }
  0x90   :  { %v48_v48 = vpop.permute.xlu1 %47 }
  0x91   :  { %v101_v29 = vmul.f32 %v80_v40, %v48_v48  ;;  %v102_v33 = vmul.f32 %v84_v43, %v48_v48  ;;  %v103_v34 = vmul.f32 %v88_v44, %v48_v48  ;;  %v104_v51 = vmul.f32 %v92_v45, %v48_v48 }
  0x92   :  { %v147_v0 = vpop.permute.xlu0 %146 }
  0x93   :  { %v197_v36 = vmul.f32 %v996_v46, %v147_v0  ;;  %v198_v39 = vmul.f32 %v998_v47, %v147_v0  ;;  %v199_v42 = vmul.f32 %v1002_v52, %v147_v0  ;;  %v137_v40 = vadd.f32 %v994_v41, %v101_v29 }
  0x94   :  { %v200_v54 = vmul.f32 %v1004_v53, %v147_v0  ;;  %v138_v56 = vadd.f32 %v994_v41, %v102_v33  ;;  %v139_v43 = vadd.f32 %v994_v41, %v103_v34  ;;  %v140_v22 = vadd.f32 %v994_v41, %v104_v51 }
  0x95   :  { %v231_v7 = vpop.permute.xlu1 %230  ;;  %v213_v44 = vadd.f32 %v197_v36, %v129_v10  ;;  %v215_v59 = vadd.f32 %v199_v42, %v131_v16  ;;  %v214_v45 = vadd.f32 %v198_v39, %v130_v15 }
  0x96   :  { %v155_v30 = vpop.permute.xlu0 %154  ;;  %v281_v28 = vmul.f32 %v1007_v2, %v231_v7  ;;  %v282_v60 = vmul.f32 %v1010_v3, %v231_v7  ;;  %v283_v48 = vmul.f32 %v1013_v4, %v231_v7  ;;  %v284_v1 = vmul.f32 %v1016_v8, %v231_v7 }
  0x97   :  { %v205_v5 = vmul.f32 %v996_v46, %v155_v30  ;;  %v206_v6 = vmul.f32 %v998_v47, %v155_v30  ;;  %v216_v10 = vadd.f32 %v200_v54, %v132_v17  ;;  %v207_v16 = vmul.f32 %v1002_v52, %v155_v30 }
  0x98   :  { %v208_v19 = vmul.f32 %v1004_v53, %v155_v30  ;;  %v298_v7 = vadd.f32 %v282_v60, %v214_v45  ;;  %v297_v30 = vadd.f32 %v281_v28, %v213_v44  ;;  %v299_v36 = vadd.f32 %v283_v48, %v215_v59 }
  0x99   :  { %v235_v31 = vpop.permute.xlu1 %234  ;;  %v300_v34 = vadd.f32 %v284_v1, %v216_v10  ;;  %v222_v39 = vadd.f32 %v206_v6, %v138_v56  ;;  %v223_v42 = vadd.f32 %v207_v16, %v139_v43 }
  0x9a   :  { %v286_v57 = vmul.f32 %v1010_v3, %v235_v31  ;;  %v285_v62 = vmul.f32 %v1007_v2, %v235_v31  ;;  %v287_v63 = vmul.f32 %v1013_v4, %v235_v31  ;;  %v288_v0 = vmul.f32 %v1016_v8, %v235_v31 }
  0x9b   :  { %v319_v61 = vpop.permute.xlu0 %318  ;;  %v221_v31 = vadd.f32 %v205_v5, %v137_v40 }
  0x9c   :  { %v302_v15 = vadd.f32 %v286_v57, %v218_v50  ;;  %v370_v20 = vmul.f32 %v1022_v13, %v319_v61  ;;  %v369_v23 = vmul.f32 %v1018_v9, %v319_v61  ;;  %v371_v24 = vmul.f32 %v1020_v11, %v319_v61 }
  0x9d   :  { %v304_v26 = vadd.f32 %v288_v0, %v220_v55  ;;  %v372_v27 = vmul.f32 %v1024_v14, %v319_v61  ;;  %v301_v29 = vadd.f32 %v285_v62, %v217_v32  ;;  %v303_v17 = vadd.f32 %v287_v63, %v219_v49 }
  0x9e   :  { %v127_v58 = vpop.permute.xlu1 %126  ;;  %v224_v50 = vadd.f32 %v208_v19, %v140_v22  ;;  %v386_v41 = vadd.f32 %v370_v20, %v302_v15 }
  0x9f   :  { %v323_v33 = vpop.permute.xlu0 %322  ;;  %v141_v51 = vadd.f32 %v127_v58, %v105_v18  ;;  %v142_v54 = vadd.f32 %v127_v58, %v106_v37  ;;  %v143_v57 = vadd.f32 %v127_v58, %v107_v38  ;;  %v144_v12 = vadd.f32 %v127_v58, %v108_v21 }
  0xa0   :  { %v373_v55 = vmul.f32 %v1018_v9, %v323_v33  ;;  %v388_v60 = vadd.f32 %v372_v27, %v304_v26  ;;  %v385_v61 = vadd.f32 %v369_v23, %v301_v29  ;;  %v387_v32 = vadd.f32 %v371_v24, %v303_v17 }
  0xa1   :  { %v374_v43 = vmul.f32 %v1022_v13, %v323_v33  ;;  %v375_v18 = vmul.f32 %v1020_v11, %v323_v33  ;;  %v376_v37 = vmul.f32 %v1024_v14, %v323_v33  ;;  %v402_v38 = vmax.f32 %v386_v41, 0.0 }
  0xa2   :  { %v404_v48 = vmax.f32 %v388_v60, 0.0  ;;  %v401_v62 = vmax.f32 %v385_v61, 0.0  ;;  %v403_v63 = vmax.f32 %v387_v32, 0.0 }
  0xa3   :  { %v159_v25 = vpop.permute.xlu1 %158 }
  0xa4   :  { %v209_v45 = vmul.f32 %v996_v46, %v159_v25  ;;  %v210_v24 = vmul.f32 %v998_v47, %v159_v25  ;;  %v212_v26 = vmul.f32 %v1004_v53, %v159_v25 }
  0xa6   :  { %v225_v47 = vadd.f32 %v209_v45, %v141_v51  ;;  %v414_v45 = vld [vmem:[%s1114_s3 + $0x8] sm:$0x3] }
  0xa8   :  { %v315_v35 = vpop.permute.xlu1 %314 }
  0xa9   :  { %v365_v49 = vmul.f32 %v1018_v9, %v315_v35  ;;  %v367_v40 = vmul.f32 %v1020_v11, %v315_v35  ;;  %v366_v44 = vmul.f32 %v1022_v13, %v315_v35  ;;  %v368_v56 = vmul.f32 %v1024_v14, %v315_v35 }
  0xab   :  { %v382_v21 = vadd.f32 %v366_v44, %v298_v7  ;;  %v384_v58 = vadd.f32 %v368_v56, %v300_v34  ;;  %v381_v59 = vadd.f32 %v365_v49, %v297_v30  ;;  %v383_v28 = vadd.f32 %v367_v40, %v299_v36 }
  0xac   :  { %v211_v7 = vmul.f32 %v1002_v52, %v159_v25  ;;  %v226_v52 = vadd.f32 %v210_v24, %v142_v54  ;;  %v228_v25 = vadd.f32 %v212_v26, %v144_v12 }
  0xad   :  { %v239_v0 = vpop.permute.xlu1 %238  ;;  %v398_v1 = vmax.f32 %v382_v21, 0.0  ;;  %v400_v5 = vmax.f32 %v384_v58, 0.0  ;;  %v397_v35 = vmax.f32 %v381_v59, 0.0  ;;  %v399_v6 = vmax.f32 %v383_v28, 0.0 }
  0xae   :  { %v289_v10 = vmul.f32 %v1007_v2, %v239_v0  ;;  %v290_v16 = vmul.f32 %v1010_v3, %v239_v0  ;;  %v291_v19 = vmul.f32 %v1013_v4, %v239_v0  ;;  %v292_v15 = vmul.f32 %v1016_v8, %v239_v0 }
  0xaf   :  { %v816_v20 = vpack.c.bf16 %v402_v38, %v398_v1  ;;  %v824_v22 = vpack.c.bf16 %v404_v48, %v400_v5  ;;  %v818_v23 = vpack.c.bf16 %v401_v62, %v397_v35  ;;  %v826_v46 = vpack.c.bf16 %v403_v63, %v399_v6  ;;  %v425_v6 = vpop.permute.xlu0 %424 }
  0xb0   :  { %v305_v27 = vadd.f32 %v289_v10, %v221_v31  ;;  %v306_v29 = vadd.f32 %v290_v16, %v222_v39  ;;  %v307_v17 = vadd.f32 %v291_v19, %v223_v42  ;;  %v308_v33 = vadd.f32 %v292_v15, %v224_v50 }
  0xb1   :  { %v243_v34 = vpop.permute.xlu1 %242  ;;  %817 = vmatprep.subr.bf16.mxu0 %v816_v20  ;;  %825 = vmatprep.subr.bf16.mxu1 %v824_v22  ;;  %v227_v53 = vadd.f32 %v211_v7, %v143_v57 }
  0xb2   :  { %v293_v30 = vmul.f32 %v1007_v2, %v243_v34  ;;  %v294_v36 = vmul.f32 %v1010_v3, %v243_v34  ;;  %v295_v41 = vmul.f32 %v1013_v4, %v243_v34  ;;  %v296_v60 = vmul.f32 %v1016_v8, %v243_v34  ;;  %819 = vmatpush1.bf16.msra.mxu0 %v818_v23 }
  0xb3   :  { %827 = vmatpush1.bf16.msra.mxu1 %v826_v46  ;;  %v390_v31 = vadd.f32 %v374_v43, %v306_v29  ;;  %v392_v39 = vadd.f32 %v376_v37, %v308_v33  ;;  %v389_v42 = vadd.f32 %v373_v55, %v305_v27  ;;  %v391_v50 = vadd.f32 %v375_v18, %v307_v17 }
  0xb4   :  { %v309_v61 = vadd.f32 %v293_v30, %v225_v47  ;;  %v310_v32 = vadd.f32 %v294_v36, %v226_v52  ;;  %v311_v49 = vadd.f32 %v295_v41, %v227_v53  ;;  %v312_v2 = vadd.f32 %v296_v60, %v228_v25 }
  0xb5   :  { %v406_v56 = vmax.f32 %v390_v31, 0.0  ;;  %v408_v55 = vmax.f32 %v392_v39, 0.0  ;;  %v405_v43 = vmax.f32 %v389_v42, 0.0  ;;  %v407_v18 = vmax.f32 %v391_v50, 0.0  ;;  %v26_v42 = vld [vmem:[%s1116_s5] sm:$0x77] }
  0xb6   :  { %v327_v40 = vpop.permute.xlu1 %326  ;;  %v618_v50 = vcombine.high %v26_v42, %v26_v42  ;;  %s912_s5 = smov [#allocation2]  }
  0xb7   :  { %v377_v3 = vmul.f32 %v1018_v9, %v327_v40  ;;  %v378_v4 = vmul.f32 %v1022_v13, %v327_v40  ;;  %v379_v8 = vmul.f32 %v1020_v11, %v327_v40  ;;  %v380_v51 = vmul.f32 %v1024_v14, %v327_v40  ;;  %v413_v11 = vld [vmem:[%s1114_s3] sm:$0xff]  ;;  %s801_s22 = sshll.u32 %s912_s5, 4  ;;  %s802_s22 = int_to_ptr.vmem [resolvable:$true] %s801_s22 }
  0xb8   :  { %v1123_v14 = vmov 0.0   ;;  %s883_s23 = scalar_lea.vmem %s802_s22, 64  ;;  %p888_p1 = scmp.lt.s32.totalorder %s802_s22, %s802_s22 }
  0xb9   :  { %v394_v54 = vadd.f32 %v378_v4, %v310_v32  ;;  %v396_v57 = vadd.f32 %v380_v51, %v312_v2  ;;  %v393_v12 = vadd.f32 %v377_v3, %v309_v61  ;;  %v395_v44 = vadd.f32 %v379_v8, %v311_v49  ;;  %p884_p0 = scmp.ne.s32.totalorder %s802_s22, %s883_s23  ;;  %p889_p2 = scmp.lt.s32.totalorder %s883_s23, %s883_s23 }
  0xbb   :  { %v410_v37 = vmax.f32 %v394_v54, 0.0  ;;  %v412_v38 = vmax.f32 %v396_v57, 0.0  ;;  %v409_v21 = vmax.f32 %v393_v12, 0.0  ;;  %v411_v58 = vmax.f32 %v395_v44, 0.0  ;;  %v420_v48 = vpop.permute.xlu1 %419  ;;  %p890_p3 = por %p889_p2, %p888_p1 }
  0xbd   :  { %v820_v59 = vpack.c.bf16 %v410_v37, %v406_v56  ;;  %v828_v9 = vpack.c.bf16 %v412_v38, %v408_v55  ;;  %v822_v28 = vpack.c.bf16 %v409_v21, %v405_v43  ;;  %v830_v13 = vpack.c.bf16 %v411_v58, %v407_v18  ;;  %p891_p4 = pnand %p890_p3, %p884_p0 }
  0xbf   :  { %821 = vmatprep.subr.bf16.mxu0 %v820_v59  ;;  %829 = vmatprep.subr.bf16.mxu1 %v828_v9 }
  0xc0   :  { %823 = vmatpush1.bf16.msra.mxu0 %v822_v28  ;;  %831 = vmatpush1.bf16.msra.mxu1 %v830_v13 }
  0xc3   :  { %812 = vmatmul.mubr.msk.f32.vlgmr.msra.gmra.mrb[0].mxu0 %vm427_vm0, %v413_v11  ;;  %814 = vmatmul.mubr.msk.f32.vlgmr.msra.gmra.mrb[0].mxu1 %vm427_vm0, %v413_v11 }
  0xc4   :  { %504 = vmatprep.mubr.f32.mxu0 %v1123_v14  ;;  %581 = vmatprep.mubr.f32.mxu1 %v1123_v14 }
  0xc7   :  { %813 = vmatmul.mubr.msk.f32.gmra.mrb[2].mxu0 %vm427_vm0, %v414_v45  ;;  %815 = vmatmul.mubr.msk.f32.gmra.mrb[2].mxu1 %vm427_vm0, %v414_v45 }
  0xc8   :  { %684 = vmatprep.mubr.f32.mxu0 %v618_v50  ;;  %782 = vmatprep.mubr.f32.mxu1 %v618_v50 }
 0x196   :  { %v500_v62 = vpop.f32.mrb[0].mxu0  ;;  %v577_v63 = vpop.f32.mrb[0].mxu1 }
 0x197   :  { %v501_v0 = vadd.f32 %v500_v62, %v420_v48  ;;  %v502_v1 = vpop.f32.mrb[1].mxu0  ;;  %v579_v5 = vpop.f32.mrb[1].mxu1  ;;  %v578_v27 = vadd.f32 %v577_v63, %v420_v48 }
 0x198   :  { %v503_v35 = vadd.f32 %v502_v1, %v420_v48  ;;  %v580_v29 = vadd.f32 %v579_v5, %v420_v48  ;;  %v1124_v5 = vld [vmem:[#allocation5_spill] sm:$0xff] }
 0x199   :  { %v588_v10 = vmul.f32 10.0, %v501_v0  ;;  %v590_v52 = vmul.f32 10.0, %v578_v27 }
 0x19a   :  { %v589_v16 = vmul.f32 10.0, %v503_v35  ;;  %v506_v19 = vpop.f32.mrb[2].mxu0  ;;  %v583_v15 = vpop.f32.mrb[2].mxu1  ;;  %v591_v53 = vmul.f32 10.0, %v580_v29 }
 0x19b   :  { %v507_v20 = vadd.f32 %v506_v19, %v425_v6  ;;  %v584_v22 = vadd.f32 %v583_v15, %v425_v6  ;;  %v508_v23 = vpop.f32.mrb[3].mxu0  ;;  %v585_v46 = vpop.f32.mrb[3].mxu1 }
 0x19c   :  { %v509_v24 = vadd.f32 %v508_v23, %v425_v6  ;;  %v586_v7 = vadd.f32 %v585_v46, %v425_v6  ;;  %v596_v26 = vmax.f32 %v588_v10, %v589_v16  ;;  %v698_v39 = vmax.f32 %v590_v52, %v591_v53 }
 0x19d   :  { %v592_v17 = vmul.f32 10.0, %v507_v20  ;;  %v594_v33 = vmul.f32 10.0, %v584_v22 }
 0x19e   :  { %v593_v34 = vmul.f32 10.0, %v509_v24  ;;  %v595_v30 = vmul.f32 10.0, %v586_v7  ;;  %597 = vmax.xlane.f32.xlu1 %v596_v26 }
 0x19f   :  { %v600_v36 = vsel %vm599_vm1, %v592_v17, -inf  ;;  %v701_v41 = vsel %vm599_vm1, %v594_v33, -inf }
 0x1a0   :  { %v601_v60 = vsel %vm599_vm1, %v593_v34, -inf  ;;  %v702_v47 = vsel %vm599_vm1, %v595_v30, -inf }
 0x1a1   :  { %v602_v25 = vmax.f32 %v600_v36, %v601_v60  ;;  %v703_v31 = vmax.f32 %v701_v41, %v702_v47 }
 0x1a3   :  { %603 = vmax.xlane.f32.xlu0 %v602_v25  ;;  %704 = vmax.xlane.f32.xlu1 %v703_v31 }
 0x1a7   :  { %699 = vmax.xlane.f32.xlu0 %v698_v39 }
 0x22b   :  { %v598_v61 = vpop.xlane.xlu1 %597 }
 0x22c   :  { %v605_v32 = vsub.f32 %v588_v10, %v598_v61  ;;  %v606_v49 = vsub.f32 %v589_v16, %v598_v61 }
 0x22e   :  { %v609_v2 = vmul.f32 1.442695, %v605_v32  ;;  %v611_v40 = vmul.f32 1.442695, %v606_v49 }
 0x230   :  { %v604_v3 = vpop.xlane.xlu0 %603  ;;  %v705_v4 = vpop.xlane.xlu1 %704  ;;  %863 = vpow2.f32 %v609_v2 }
 0x231   :  { %v607_v8 = vsub.f32 %v592_v17, %v604_v3  ;;  %v608_v51 = vsub.f32 %v593_v34, %v604_v3  ;;  %v708_v54 = vsub.f32 %v594_v33, %v705_v4  ;;  %v709_v57 = vsub.f32 %v595_v30, %v705_v4 }
 0x232   :  { %865 = vpow2.f32 %v611_v40 }
 0x233   :  { %v613_v12 = vmul.f32 1.442695, %v607_v8  ;;  %v615_v44 = vmul.f32 1.442695, %v608_v51  ;;  %v714_v56 = vmul.f32 1.442695, %v708_v54 }
 0x234   :  { %v716_v55 = vmul.f32 1.442695, %v709_v57  ;;  %v700_v43 = vpop.xlane.xlu0 %699 }
 0x235   :  { %867 = vpow2.f32 %v613_v12  ;;  %v706_v18 = vsub.f32 %v590_v52, %v700_v43  ;;  %v707_v37 = vsub.f32 %v591_v53, %v700_v43 }
 0x236   :  { %869 = vpow2.f32 %v615_v44 }
 0x237   :  { %871 = vpow2.f32 %v714_v56  ;;  %v710_v38 = vmul.f32 1.442695, %v706_v18  ;;  %v712_v21 = vmul.f32 1.442695, %v707_v37 }
 0x238   :  { %873 = vpow2.f32 %v716_v55 }
 0x239   :  { %875 = vpow2.f32 %v710_v38 }
 0x23a   :  { %877 = vpow2.f32 %v712_v21  ;;  %v864_v58 = vpop.eup %863 }
 0x23c   :  { %v866_v59 = vpop.eup %865 }
 0x23f   :  { %v868_v9 = vpop.eup %867 }
 0x240   :  { %v870_v28 = vpop.eup %869  ;;  %v834_v13 = vpack.c.bf16 %v868_v9, %v864_v58 }
 0x241   :  { %v872_v11 = vpop.eup %871  ;;  %v832_v14 = vpack.c.bf16 %v870_v28, %v866_v59 }
 0x242   :  { %v874_v45 = vpop.eup %873 }
 0x243   :  { %v876_v48 = vpop.eup %875  ;;  %833 = vmatprep.subr.bf16.mxu0 %v832_v14 }
 0x244   :  { %v878_v62 = vpop.eup %877  ;;  %835 = vmatpush1.bf16.xpose.msra.mxu0 %v834_v13  ;;  %v838_v63 = vpack.c.bf16 %v872_v11, %v876_v48 }
 0x245   :  { %v836_v0 = vpack.c.bf16 %v874_v45, %v878_v62 }
 0x247   :  { %837 = vmatprep.subr.bf16.mxu1 %v836_v0 }
 0x248   :  { %839 = vmatpush1.bf16.xpose.msra.mxu1 %v838_v63 }
 0x24b   :  { %685 = vmatmul.mubr.f32.vlgmr.msra.gmra.mrb[4].mxu0 %v26_v42 }
 0x24f   :  { %783 = vmatmul.mubr.f32.vlgmr.msra.gmra.mrb[4].mxu1 %v26_v42 }
 0x31e   :  { %v686_v1 = vpop.f32.mrb[4].mxu0 }
 0x31f   :  { %v693_v35 = vrot.slane %v686_v1, %v1124_v5  ;;  %v688_v6 = vpop.f32.mrb[5].mxu0 }
 0x321   :  { %879 = vrcp.f32 %v693_v35 }
 0x322   :  { %v784_v10 = vpop.f32.mrb[4].mxu1 }
 0x323   :  { %v791_v16 = vrot.slane %v784_v10, %v1124_v5  ;;  %v786_v19 = vpop.f32.mrb[5].mxu1 }
 0x325   :  { %881 = vrcp.f32 %v791_v16 }
 0x32b   :  { %v880_v15 = vpop.eup %879 }
 0x32c   :  { %v695_v20 = vmul.f32 %v880_v15, %v686_v1 }
 0x32e   :  { %697 = vst.msk [vmem:[#allocation2] sm:$0x3] %vm696_vm2, %v695_v20 }
 0x32f   :  { %v882_v22 = vpop.eup %881 }
 0x330   :  { %v793_v23 = vmul.f32 %v882_v22, %v784_v10 }
 0x332   :  { %795 = vst.msk [vmem:[#allocation2 + $0x2] sm:$0x3] %vm696_vm2, %v793_v23 }
 0x333   :  { %894 = shalt.err (!%p891_p4)
}
 0x334   :  { %s895_s26 = scalar_lea.hbm %s1117_s6, 64 }
 0x335   :  { %p896_p5 = scmp.ne.s32.totalorder %s1117_s6, %s895_s26  ;;  %p899_p6 = scmp.lt.u32.totalorder %s895_s26, %s1117_s6 }
 0x337   :  { %p901_p7 = pnand %p899_p6, %p896_p5 }
 0x339   :  { %904 = shalt.err (!%p901_p7)
}
 0x33a   :  { %s913_s7 = smov 32   ;;  %s914_s8 = smov 2  }
 0x33b   :  { %807 = dma.vmem_to_hbm [thread:$0]  %s802_s22, 64, %s1117_s6, [#allocation3], %s913_s7, %s913_s7, %s914_s8  }
 0x33c   :  { %905 = dma.done.wait [#allocation3], 64  }
 0x33d   :  { %906 = vsyncadd [#allocation3], 4294967232 }
 0x33e   :  { %811 = vsyncpa [#allocation3], 1 }

</bundles_post_ra>
